<compile_context>
chip_gen: v6e
topology: v6e:2x2x1
jax: 0.10.0
libtpu: 0.0.40
codegen_flags: <defaults>
</compile_context>

<pallas_src>
import functools

import jax
import jax.numpy as jnp
import numpy as np
from jax.experimental import pallas as pl
from jax.experimental.pallas import tpu as pltpu


def _build_pe(d_model: int, max_len: int = 5000) -> jnp.ndarray:
    """Positional-encoding table with the exact numerics of the torch __init__.

    Returned shape is (max_len, d_model): the size-1 batch dim of the torch
    buffer (max_len, 1, d_model) is squeezed; it is re-inserted by broadcasting.
    """
    position = np.arange(0, max_len, dtype=np.float32)[:, None]          # (max_len, 1)
    div_term = np.exp(
        np.arange(0, d_model, 2, dtype=np.float32) * (-np.log(10000.0) / d_model)
    )
    pe = np.zeros((max_len, d_model), dtype=np.float32)
    pe[:, 0::2] = np.sin(position * div_term)
    pe[:, 1::2] = np.cos(position * div_term[: (d_model // 2)])
    return jnp.asarray(pe)


def _tile_lanes(t: jnp.ndarray, reps: int) -> jnp.ndarray:
    """Tile t (rows, D) `reps` times along the last (lane) axis; O(log reps) concats."""
    if reps == 1:
        return t
    out = t
    built = 1
    while built * 2 <= reps:
        out = jnp.concatenate([out, out], axis=-1)
        built *= 2
    if built < reps:
        out = jnp.concatenate([out, _tile_lanes(t, reps - built)], axis=-1)
    return out


def _pe_add_kernel(x_ref, pe_ref, o_ref, *, batch: int):
    # x_ref / o_ref: (TS, B*D) lane-dense tiles; pe_ref: (TS, D).
    o_ref[...] = x_ref[...] + _tile_lanes(pe_ref[...], batch)


def _round_up(v: int, m: int) -> int:
    return -(-v // m) * m


def positional_encoding_forward(
    x: jnp.ndarray,
    pe: jnp.ndarray,
    *,
    block_rows=None,
    donate_x: bool = False,
    force_pallas: bool = False,
) -> jnp.ndarray:
    """x: (S, B, D); pe: (max_len, D). Returns x + pe[:S] broadcast over batch."""
    S, B, D = x.shape
    max_len = pe.shape[0]
    if S > max_len:
        # The PyTorch module would index past the buffer; fail loudly instead.
        raise ValueError(f"sequence length {S} exceeds positional table max_len {max_len}")

    pe = pe.astype(x.dtype)

    # Tiny inputs: pallas_call launch + pipeline setup dwarfs a small add.
    if not force_pallas and (x.size * x.dtype.itemsize) < (1 << 20):
        return x + pe[:S][:, None, :]

    # Lane-dense layout: (S, B, D) -> (S, B*D); contiguous, so the reshape is free.
    BD = B * D
    x2 = x.reshape(S, BD)

    # Block size: ~2 MiB of x per grid step (multiple of 8 rows). This keeps the
    # double-buffered footprint (2x x-in + 2x out + 2x pe blocks + tiled-pe temp,
    # ~10 MiB) under the scoped VMEM limit on v5e/v6e/v7x while getting close to
    # the HBM roofline for this purely memory-bound add.
    if block_rows is None:
        bytes_per_row = BD * x.dtype.itemsize
        target_bytes = 2 * 1024 * 1024
        block_rows = max(8, (target_bytes // max(1, bytes_per_row)) // 8 * 8)
    ts = max(8, min(int(block_rows), _round_up(S, 8)))

    grid = (pl.cdiv(S, ts),)
    kernel = functools.partial(_pe_add_kernel, batch=B)

    call_kwargs = {}
    if donate_x:
        # Write the result in place of x (caller must be able to donate x).
        call_kwargs["input_output_aliases"] = {0: 0}

    out2 = pl.pallas_call(
        kernel,
        out_shape=jax.ShapeDtypeStruct((S, BD), x.dtype),
        grid_spec=pltpu.PrefetchScalarGridSpec(
            num_scalar_prefetch=0,
            grid=grid,
            in_specs=[
                pl.BlockSpec((ts, BD), lambda s: (s, 0)),  # x tile, lane-dense
                pl.BlockSpec((ts, D), lambda s: (s, 0)),   # pe rows [s*ts, s*ts+ts)
            ],
            out_specs=pl.BlockSpec((ts, BD), lambda s: (s, 0)),
        ),
        compiler_params=pltpu.CompilerParams(
            dimension_semantics=("parallel",),  # shards across TCs on v7x megacore
        ),
        **call_kwargs,
    )(x2, pe)

    return out2.reshape(S, B, D)


if __name__ == "__main__":
    MAX_LEN = 5000  # torch default; the table is small (5000 * 32 * 4B = 640 KiB)

    key = jax.random.PRNGKey(0)
    k1, k2 = jax.random.split(key)

    # Case 1: module-sized shapes (seq=8, batch=2, d_model=32), single block.
    S1, B1, D1 = 8, 2, 32
    pe1 = _build_pe(D1, max_len=MAX_LEN)
    x1 = jax.random.normal(k1, (S1, B1, D1), dtype=jnp.float32)
    out1 = jax.block_until_ready(positional_encoding_forward(x1, pe1, force_pallas=True))
    ref1 = x1 + pe1[:S1][:, None, :]
    np.testing.assert_allclose(np.asarray(out1), np.asarray(ref1), rtol=1e-6, atol=1e-6)

    # Case 2: longer sequence with an explicit small block to exercise the
    # multi-step grid and the fully lane-dense (B*D = 128) store path.
    S2, B2, D2 = 64, 4, 32
    pe2 = _build_pe(D2, max_len=MAX_LEN)
    x2 = jax.random.normal(k2, (S2, B2, D2), dtype=jnp.float32)
    out2 = jax.block_until_ready(
        positional_encoding_forward(x2, pe2, block_rows=16, force_pallas=True)
    )
    ref2 = x2 + pe2[:S2][:, None, :]
    np.testing.assert_allclose(np.asarray(out2), np.asarray(ref2), rtol=1e-6, atol=1e-6)

    print("KERNEL_OK")
</pallas_src>

<mosaic_0001>
module attributes {stable_mosaic.version = 11 : i64} {
  func.func @_pe_add_kernel(%arg0: i32, %arg1: memref<8x64xf32, #tpu.memory_space<vmem>>, %arg2: memref<8x32xf32, #tpu.memory_space<vmem>>, %arg3: memref<8x64xf32, #tpu.memory_space<vmem>>) attributes {dimension_semantics = [#tpu.dimension_semantics<parallel>], iteration_bounds = array<i64: 1>, scalar_prefetch = 0 : i64, scratch_operands = 0 : i64, tpu.core_type = #tpu.core_type<tc>, window_params = [{transform_indices = @transform_0, window_bounds = array<i64: 8, 64>}, {transform_indices = @transform_1, window_bounds = array<i64: 8, 32>}, {transform_indices = @transform_2, window_bounds = array<i64: 8, 64>}]} {
    %c0 = arith.constant 0 : index
    %c0_0 = arith.constant 0 : index
    %0 = vector.load %arg1[%c0, %c0_0] : memref<8x64xf32, #tpu.memory_space<vmem>>, vector<8x64xf32>
    %c0_1 = arith.constant 0 : index
    %c0_2 = arith.constant 0 : index
    %1 = vector.load %arg2[%c0_1, %c0_2] : memref<8x32xf32, #tpu.memory_space<vmem>>, vector<8x32xf32>
    %2 = tpu.concatenate %1, %1 in 1 : vector<8x32xf32>, vector<8x32xf32> -> vector<8x64xf32>
    %3 = arith.addf %0, %2 : vector<8x64xf32>
    %c0_3 = arith.constant 0 : index
    %c0_4 = arith.constant 0 : index
    %4 = vector.load %arg3[%c0_3, %c0_4] : memref<8x64xf32, #tpu.memory_space<vmem>>, vector<8x64xf32>
    tpu.vector_store %arg3[%c0_3, %c0_4], %3 {strides = array<i32>} : memref<8x64xf32, #tpu.memory_space<vmem>>, vector<8x64xf32>,
    return
  }
  func.func @transform_0(%arg0: i32) -> (i32, i32) {
    %c0_i32 = arith.constant 0 : i32
    %c0_i32_0 = arith.constant 0 : i32
    return %arg0, %c0_i32 : i32, i32
  }
  func.func @transform_1(%arg0: i32) -> (i32, i32) {
    %c0_i32 = arith.constant 0 : i32
    %c0_i32_0 = arith.constant 0 : i32
    return %arg0, %c0_i32 : i32, i32
  }
  func.func @transform_2(%arg0: i32) -> (i32, i32) {
    %c0_i32 = arith.constant 0 : i32
    %c0_i32_0 = arith.constant 0 : i32
    return %arg0, %c0_i32 : i32, i32
  }
}

</mosaic_0001>

<bundles_post_ra>
// kernel: tpu_custom_call.1
= control target key start
LH: loop header
LB: loop body
LE: loop exit
PB: predicated region body
PF: predicated region fallthrough
CT: control target
= control target key end

     0   :  { %s87_s0 = inlined_call_operand.vmem [shape: f32[8,64], index: 0, kind: input, shape index: {}]   ;;  %s88_s1 = inlined_call_operand.vmem [shape: f32[5000,32], index: 1, kind: input, shape index: {}]   ;;  %s89_s2 = inlined_call_operand.hbm [shape: f32[8,64], index: 2, kind: output, shape index: {}]  }
   0x1   :  { %v13_v0 = vld [vmem:[%s88_s1] sm:$0xff] }
   0x2   :  { %7 = vsyncpa [#allocation3], 0  ;;  %s61_s11 = smov 32   ;;  %vm18_vm0 = vcmask 261120   ;;  %v12_v1 = vld [vmem:[%s87_s0] sm:$0xff]  ;;  %s62_s14 = smov [#allocation2]  }
   0x3   :  { %15 = vrot.lane.b32.xlu0 %v13_v0, %s61_s11  ;;  %s29_s15 = sshll.u32 %s62_s14, 4  ;;  %vm21_vm1 = vcmask 523264   ;;  %s30_s15 = int_to_ptr.vmem [resolvable:$true] %s29_s15 }
   0x4   :  { %s39_s16 = scalar_lea.vmem %s30_s15, 128  ;;  %p44_p1 = scmp.lt.s32.totalorder %s30_s15, %s30_s15 }
   0x5   :  { %p40_p0 = scmp.ne.s32.totalorder %s30_s15, %s39_s16  ;;  %p45_p2 = scmp.lt.s32.totalorder %s39_s16, %s39_s16 }
   0x7   :  { %p46_p3 = por %p45_p2, %p44_p1 }
   0x9   :  { %p47_p4 = pnand %p46_p3, %p40_p0 }
  0x75   :  { %v16_v2 = vpop.permute.xlu0 %15 }
  0x76   :  { %v19_v3 = vsel %vm18_vm0, %v13_v0, %v16_v2 }
  0x77   :  { %v20_v4 = vadd.f32 %v19_v3, %v12_v1 }
  0x79   :  { %22 = vst.msk [vmem:[#allocation2] sm:$0xff] %vm21_vm1, %v20_v4 }
  0x7a   :  { %50 = shalt.err (!%p47_p4)
}
  0x7b   :  { %32 = dma.vmem_to_hbm [thread:$0]  %s30_s15, 128, %s89_s2, [#allocation3]  }
  0x7c   :  { %59 = dma.done.wait [#allocation3], 128  }
  0x7d   :  { %60 = vsyncadd [#allocation3], 4294967168 }
  0x7e   :  { %36 = vsyncpa [#allocation3], 1 }

</bundles_post_ra>
